<compile_context>
chip_gen: v7x
topology: tpu7x:2x2x1
jax: 0.10.0
libtpu: 0.0.40
codegen_flags: <defaults>
</compile_context>

<pallas_src>
import functools
import math

import jax
import jax.numpy as jnp
from jax import lax
from jax.experimental import pallas as pl
from jax.experimental.pallas import tpu as pltpu

_LANE = 128
_TARGET_CHUNKS = 64      # preferred 128-lane chunks per row in path A (8192 lanes)
_MAX_CHUNKS = 256        # hard cap on the unrolled chunk loop (code size / VMEM)


# ---------------------------------------------------------------------------
# Path A kernel: (rows, n_row) layout, full sublane occupancy, strip-mined rows.
# ---------------------------------------------------------------------------
def _dice_rows_kernel(x_ref, t_ref, out_ref, *, apply_sigmoid, num_chunks,
                      sub, rows_total, rows_block, even):
    if even:
        n_strips = rows_block // sub                      # static trip count
    else:
        i = pl.program_id(0)                              # ragged last block
        valid = jnp.minimum(rows_block, rows_total - i * rows_block)
        n_strips = valid // sub                           # rows_total % sub == 0

    def strip_body(s_idx, carry):
        r0 = pl.multiple_of(s_idx * sub, sub)
        inter = jnp.zeros((sub, _LANE), jnp.float32)
        union = jnp.zeros((sub, _LANE), jnp.float32)
        # Statically unrolled, 128-lane-aligned chunk loop.  Only the two tiny
        # (sub, 128) accumulators live across it -> no vreg spills.
        for k in range(num_chunks):
            x = x_ref[pl.ds(r0, sub), k * _LANE:(k + 1) * _LANE].astype(jnp.float32)
            t = t_ref[pl.ds(r0, sub), k * _LANE:(k + 1) * _LANE].astype(jnp.float32)
            if apply_sigmoid:
                x = jax.nn.sigmoid(x)
            inter = inter + x * t
            union = union + (x + t)        # fused: sum(x) + sum(t) == sum(x + t)
        out_ref[pl.ds(r0, sub), 0:_LANE] = inter
        out_ref[pl.ds(r0, sub), _LANE:2 * _LANE] = union
        return carry

    lax.fori_loop(0, n_strips, strip_body, 0)


# ---------------------------------------------------------------------------
# Path B kernel: (batch, N) layout, tile along N, mask the ragged tail chunk.
# ---------------------------------------------------------------------------
def _dice_cols_kernel(x_ref, t_ref, out_ref, *, apply_sigmoid, chunks_per_block,
                      n_valid, grid_len, batch):
    j = pl.program_id(0)
    base = j * (chunks_per_block * _LANE)
    lane = lax.broadcasted_iota(jnp.int32, (batch, _LANE), 1)
    inter = jnp.zeros((batch, _LANE), jnp.float32)
    union = jnp.zeros((batch, _LANE), jnp.float32)
    for k in range(chunks_per_block):
        x = x_ref[:, k * _LANE:(k + 1) * _LANE].astype(jnp.float32)
        t = t_ref[:, k * _LANE:(k + 1) * _LANE].astype(jnp.float32)
        if apply_sigmoid:
            x = jax.nn.sigmoid(x)
        # Static per-chunk decision: only chunks that can run past the true
        # element count (on the last grid step) pay for the mask.
        if ((grid_len - 1) * chunks_per_block + k + 1) * _LANE > n_valid:
            rem = n_valid - (base + k * _LANE)            # dynamic scalar
            m = lane < rem                                # all-true for j < last
            x = jnp.where(m, x, 0.0)
            t = jnp.where(m, t, 0.0)
        inter = inter + x * t
        union = union + (x + t)
    out_ref[:, 0:_LANE] = inter
    out_ref[:, _LANE:2 * _LANE] = union


def _vmem_capacity_bytes():
    try:
        cap = int(getattr(pltpu.get_tpu_info(), "vmem_capacity_bytes", 0))
        if cap > 0:
            return cap
    except Exception:
        pass
    try:
        kind = jax.devices()[0].device_kind.lower()
        if any(tag in kind for tag in ("v4", "v5", "v6")):
            return 128 * 1024 * 1024        # 128-MiB-VMEM generations
    except Exception:
        pass
    return 64 * 1024 * 1024                  # conservative: v7x / unknown


def dice_loss(inputs, targets, smooth=1e-6, apply_sigmoid=True):
    if inputs.shape != targets.shape:
        raise ValueError(
            f"Inputs ({inputs.shape}) and targets ({targets.shape}) "
            f"must have the same shape")

    batch = inputs.shape[0]
    n = int(math.prod(inputs.shape[1:])) if inputs.ndim > 1 else 1
    x = inputs.reshape(batch, n)
    t = targets.reshape(batch, n)

    isx = jnp.dtype(x.dtype).itemsize
    ist = jnp.dtype(t.dtype).itemsize
    packing = max(1, 4 // max(1, min(isx, ist)))
    sub = 8 * packing                         # row alignment & strip size

    vmem_cap = _vmem_capacity_bytes()
    in_budget = max(4 * 1024 * 1024, min(24 * 1024 * 1024, vmem_cap // 4))

    # ---- Path A: find N = s * (c*128) with batch*s % sub == 0 (free reshape).
    plan = None
    if n % _LANE == 0:
        m = n // _LANE
        s_req = sub // math.gcd(batch, sub)
        cands = set()
        d = 1
        while d * d <= m:
            if m % d == 0:
                for cand in (d, m // d):
                    if cand % s_req == 0 and m // cand <= _MAX_CHUNKS:
                        cands.add(cand)
            d += 1
        if cands:
            s = min(sorted(cands), key=lambda v: abs(m // v - _TARGET_CHUNKS))
            plan = (s, m // s)

    if plan is not None:
        s, c = plan
        n_row = c * _LANE
        rows = batch * s                       # multiple of `sub` by construction
        x = x.reshape(rows, n_row)             # layout-preserving: no HBM copy
        t = t.reshape(rows, n_row)

        strips_total = rows // sub
        bytes_per_strip = sub * n_row * (isx + ist)
        max_strips = max(1, in_budget // (2 * bytes_per_strip))
        g = pl.cdiv(strips_total, max_strips)
        if strips_total >= 2:
            g = max(g, 2)                      # >=2 parallel steps for megacore
        if g > 1 and g % 2:
            g += 1                             # even step count: balanced 2 TCs
        g = min(g, strips_total)
        block_strips = pl.cdiv(strips_total, g)
        rows_block = block_strips * sub
        grid_len = pl.cdiv(rows, rows_block)
        even = (rows % rows_block == 0)

        in_block = rows_block * n_row * (isx + ist)
        out_block = rows_block * 2 * _LANE * 4
        vmem_limit = 2 * (in_block + out_block) + 16 * 1024 * 1024
        vmem_limit = int(min(max(vmem_limit, 32 * 1024 * 1024), (vmem_cap * 3) // 4))

        kernel = functools.partial(
            _dice_rows_kernel, apply_sigmoid=apply_sigmoid, num_chunks=c,
            sub=sub, rows_total=rows, rows_block=rows_block, even=even)
        part = pl.pallas_call(
            kernel,
            out_shape=jax.ShapeDtypeStruct((rows, 2 * _LANE), jnp.float32),
            grid_spec=pltpu.PrefetchScalarGridSpec(
                num_scalar_prefetch=0,
                grid=(grid_len,),
                in_specs=[pl.BlockSpec((rows_block, n_row), lambda i: (i, 0)),
                          pl.BlockSpec((rows_block, n_row), lambda i: (i, 0))],
                out_specs=pl.BlockSpec((rows_block, 2 * _LANE), lambda i: (i, 0))),
            compiler_params=pltpu.CompilerParams(
                dimension_semantics=("parallel",),
                vmem_limit_bytes=vmem_limit),
        )(x, t)
        inter = part[:, :_LANE].reshape(batch, s * _LANE).sum(axis=-1)
        union = part[:, _LANE:].reshape(batch, s * _LANE).sum(axis=-1)
    else:
        # ---- Path B: tile along flattened N; mask the ragged tail in-kernel.
        mt = pl.cdiv(n, _LANE)
        rows_eff = max(batch, 2 * sub)         # VMEM sublane-padding estimate
        max_cb = max(1, in_budget // (2 * rows_eff * _LANE * (isx + ist)))
        max_cb = min(max_cb, 128)              # bound unrolled chunk loop
        g = pl.cdiv(mt, max_cb)
        if mt >= 2:
            g = max(g, 2)
        if g > 1 and g % 2:
            g += 1
        g = min(g, mt)
        cb = pl.cdiv(mt, g)
        grid_len = pl.cdiv(mt, cb)
        block_n = cb * _LANE

        in_block = rows_eff * block_n * (isx + ist)
        out_block = rows_eff * 2 * _LANE * 4
        vmem_limit = 2 * (in_block + out_block) + 16 * 1024 * 1024
        vmem_limit = int(min(max(vmem_limit, 32 * 1024 * 1024), (vmem_cap * 3) // 4))

        kernel = functools.partial(
            _dice_cols_kernel, apply_sigmoid=apply_sigmoid, chunks_per_block=cb,
            n_valid=n, grid_len=grid_len, batch=batch)
        part = pl.pallas_call(
            kernel,
            out_shape=jax.ShapeDtypeStruct((batch, grid_len * 2 * _LANE),
                                           jnp.float32),
            grid_spec=pltpu.PrefetchScalarGridSpec(
                num_scalar_prefetch=0,
                grid=(grid_len,),
                in_specs=[pl.BlockSpec((batch, block_n), lambda j: (0, j)),
                          pl.BlockSpec((batch, block_n), lambda j: (0, j))],
                out_specs=pl.BlockSpec((batch, 2 * _LANE), lambda j: (0, j))),
            compiler_params=pltpu.CompilerParams(
                dimension_semantics=("parallel",),
                vmem_limit_bytes=vmem_limit),
        )(x, t)
        part = part.reshape(batch, grid_len, 2, _LANE)
        inter = part[:, :, 0, :].sum(axis=(1, 2))
        union = part[:, :, 1, :].sum(axis=(1, 2))

    # Tiny scalar glue: one cross-lane reduce per batch element, then dice.
    dice = (2.0 * inter + smooth) / (union + smooth)
    return 1.0 - jnp.mean(dice)


def _reference_dice_loss(inputs, targets, smooth=1e-6, apply_sigmoid=True):
    x = inputs.astype(jnp.float32)
    if apply_sigmoid:
        x = jax.nn.sigmoid(x)
    t = targets.astype(jnp.float32)
    b = x.shape[0]
    x = x.reshape(b, -1)
    t = t.reshape(b, -1)
    inter = jnp.sum(x * t, axis=-1)
    union = jnp.sum(x, axis=-1) + jnp.sum(t, axis=-1)
    dice = (2.0 * inter + smooth) / (union + smooth)
    return 1.0 - jnp.mean(dice)


if __name__ == "__main__":
    key = jax.random.PRNGKey(0)
    k1, k2, k3, k4 = jax.random.split(key, 4)

    # Case 1: NCHW f32, lane-aligned flattened size -> Path A (no padding).
    logits = jax.random.normal(k1, (2, 4, 16, 16), dtype=jnp.float32)
    targets = (jax.random.uniform(k2, (2, 4, 16, 16)) > 0.5).astype(jnp.float32)
    loss = jax.block_until_ready(dice_loss(logits, targets))
    ref = _reference_dice_loss(logits, targets)
    assert jnp.allclose(loss, ref, atol=1e-5, rtol=1e-5), (loss, ref)

    # Case 2: non-128-divisible flattened size -> Path B (in-kernel tail mask,
    # no wrapper-side jnp.pad).
    logits2 = jax.random.normal(k3, (2, 3, 15, 17), dtype=jnp.float32)
    targets2 = (jax.random.uniform(k4, (2, 3, 15, 17)) > 0.5).astype(jnp.float32)
    loss2 = jax.block_until_ready(dice_loss(logits2, targets2))
    ref2 = _reference_dice_loss(logits2, targets2)
    assert jnp.allclose(loss2, ref2, atol=1e-5, rtol=1e-5), (loss2, ref2)

    # Case 3: bf16 logits read natively (no f32 pre-cast in the wrapper).
    logits3 = logits.astype(jnp.bfloat16)
    loss3 = jax.block_until_ready(dice_loss(logits3, targets))
    ref3 = _reference_dice_loss(logits3, targets)
    assert jnp.allclose(loss3, ref3, atol=1e-4, rtol=1e-4), (loss3, ref3)

    print("KERNEL_OK")
</pallas_src>

<mosaic_0001>
module attributes {stable_mosaic.version = 11 : i64} {
  func.func @_dice_rows_kernel(%arg0: i32, %arg1: memref<8x256xf32, #tpu.memory_space<vmem>>, %arg2: memref<8x256xf32, #tpu.memory_space<vmem>>, %arg3: memref<8x256xf32, #tpu.memory_space<vmem>>) attributes {dimension_semantics = [#tpu.dimension_semantics<parallel>], iteration_bounds = array<i64: 1>, scalar_prefetch = 0 : i64, scratch_operands = 0 : i64, tpu.core_type = #tpu.core_type<tc>, window_params = [{transform_indices = @transform_0, window_bounds = array<i64: 8, 256>}, {transform_indices = @transform_1, window_bounds = array<i64: 8, 256>}, {transform_indices = @transform_2, window_bounds = array<i64: 8, 256>}]} {
    %c0_i32 = arith.constant 0 : i32
    %c8_i32 = arith.constant 8 : i32
    %0 = arith.muli %c0_i32, %c8_i32 : i32
    %1 = tpu.assume_multiple %0, 8 : i32
    %cst = arith.constant 0.000000e+00 : f32
    %2 = vector.broadcast %cst : f32 to vector<8x128xf32>
    %cst_0 = arith.constant 0.000000e+00 : f32
    %3 = vector.broadcast %cst_0 : f32 to vector<8x128xf32>
    %4 = arith.index_cast %1 : i32 to index
    %c0 = arith.constant 0 : index
    %5 = vector.load %arg1[%4, %c0] : memref<8x256xf32, #tpu.memory_space<vmem>>, vector<8x128xf32>
    %6 = arith.index_cast %1 : i32 to index
    %c0_1 = arith.constant 0 : index
    %7 = vector.load %arg2[%6, %c0_1] : memref<8x256xf32, #tpu.memory_space<vmem>>, vector<8x128xf32>
    %8 = arith.negf %5 : vector<8x128xf32>
    %9 = math.exp %8 : vector<8x128xf32>
    %cst_2 = arith.constant 1.000000e+00 : f32
    %10 = vector.broadcast %cst_2 : f32 to vector<8x128xf32>
    %11 = arith.addf %10, %9 : vector<8x128xf32>
    %12 = arith.divf %10, %11 : vector<8x128xf32>
    %13 = arith.mulf %12, %7 : vector<8x128xf32>
    %14 = arith.addf %2, %13 : vector<8x128xf32>
    %15 = arith.addf %12, %7 : vector<8x128xf32>
    %16 = arith.addf %3, %15 : vector<8x128xf32>
    %17 = arith.index_cast %1 : i32 to index
    %c128 = arith.constant 128 : index
    %18 = vector.load %arg1[%17, %c128] : memref<8x256xf32, #tpu.memory_space<vmem>>, vector<8x128xf32>
    %19 = arith.index_cast %1 : i32 to index
    %c128_3 = arith.constant 128 : index
    %20 = vector.load %arg2[%19, %c128_3] : memref<8x256xf32, #tpu.memory_space<vmem>>, vector<8x128xf32>
    %21 = arith.negf %18 : vector<8x128xf32>
    %22 = math.exp %21 : vector<8x128xf32>
    %cst_4 = arith.constant 1.000000e+00 : f32
    %23 = vector.broadcast %cst_4 : f32 to vector<8x128xf32>
    %24 = arith.addf %23, %22 : vector<8x128xf32>
    %25 = arith.divf %23, %24 : vector<8x128xf32>
    %26 = arith.mulf %25, %20 : vector<8x128xf32>
    %27 = arith.addf %14, %26 : vector<8x128xf32>
    %28 = arith.addf %25, %20 : vector<8x128xf32>
    %29 = arith.addf %16, %28 : vector<8x128xf32>
    %30 = arith.index_cast %1 : i32 to index
    %c0_5 = arith.constant 0 : index
    %31 = vector.load %arg3[%30, %c0_5] : memref<8x256xf32, #tpu.memory_space<vmem>>, vector<8x128xf32>
    tpu.vector_store %arg3[%30, %c0_5], %27 {strides = array<i32>} : memref<8x256xf32, #tpu.memory_space<vmem>>, vector<8x128xf32>,
    %32 = arith.index_cast %1 : i32 to index
    %c128_6 = arith.constant 128 : index
    %33 = vector.load %arg3[%32, %c128_6] : memref<8x256xf32, #tpu.memory_space<vmem>>, vector<8x128xf32>
    tpu.vector_store %arg3[%32, %c128_6], %29 {strides = array<i32>} : memref<8x256xf32, #tpu.memory_space<vmem>>, vector<8x128xf32>,
    %c1_i32 = arith.constant 1 : i32
    return
  }
  func.func @transform_0(%arg0: i32) -> (i32, i32) {
    %c0_i32 = arith.constant 0 : i32
    %c0_i32_0 = arith.constant 0 : i32
    return %arg0, %c0_i32 : i32, i32
  }
  func.func @transform_1(%arg0: i32) -> (i32, i32) {
    %c0_i32 = arith.constant 0 : i32
    %c0_i32_0 = arith.constant 0 : i32
    return %arg0, %c0_i32 : i32, i32
  }
  func.func @transform_2(%arg0: i32) -> (i32, i32) {
    %c0_i32 = arith.constant 0 : i32
    %c0_i32_0 = arith.constant 0 : i32
    return %arg0, %c0_i32 : i32, i32
  }
}

</mosaic_0001>

<bundles_post_ra>
// kernel: tpu_custom_call.1
= control target key start
LH: loop header
LB: loop body
LE: loop exit
PB: predicated region body
PF: predicated region fallthrough
CT: control target
= control target key end

     0   :  { %7 = vsyncpa [#allocation3], 0  ;;  %s224_s0 = inlined_call_operand.hbm [shape: f32[8,256], index: 0, kind: input, shape index: {}]   ;;  %s225_s1 = inlined_call_operand.hbm [shape: f32[8,256], index: 1, kind: input, shape index: {}]   ;;  %s226_s2 = inlined_call_operand.hbm [shape: f32[8,256], index: 2, kind: output, shape index: {}]  }
   0x1   :  { %8 = vsyncpa [#allocation6], 0 }
   0x2   :  { %9 = vsyncpa [#allocation4], 0  ;;  %s170_s9 = smov [#allocation2]   ;;  %s171_s11 = smov [#allocation5]  }
   0x3   :  { %s16_s10 = sshll.u32 %s170_s9, 4  ;;  %s26_s12 = sshll.u32 %s171_s11, 4  ;;  %s17_s10 = int_to_ptr.vmem [resolvable:$true] %s16_s10  ;;  %s27_s12 = int_to_ptr.vmem [resolvable:$true] %s26_s12 }
   0x4   :  { %s98_s15 = scalar_lea.hbm %s224_s0, 256 }
   0x5   :  { %p99_p0 = scmp.ne.s32.totalorder %s224_s0, %s98_s15  ;;  %p102_p1 = scmp.lt.u32.totalorder %s98_s15, %s224_s0 }
   0x7   :  { %p104_p2 = pnand %p102_p1, %p99_p0 }
   0x9   :  { %107 = shalt.err (!%p104_p2)
}
   0xa   :  { %s108_s20 = scalar_lea.vmem %s17_s10, 256  ;;  %p113_p4 = scmp.lt.s32.totalorder %s17_s10, %s17_s10 }
   0xb   :  { %p109_p3 = scmp.ne.s32.totalorder %s17_s10, %s108_s20  ;;  %p114_p5 = scmp.lt.s32.totalorder %s108_s20, %s108_s20 }
   0xd   :  { %p115_p6 = por %p114_p5, %p113_p4 }
   0xf   :  { %p116_p7 = pnand %p115_p6, %p109_p3 }
  0x11   :  { %119 = shalt.err (!%p116_p7)
}
  0x12   :  { %19 = dma.hbm_to_vmem [thread:$0]  %s224_s0, 256, %s17_s10, [#allocation3]  }
  0x13   :  { %s120_s25 = scalar_lea.hbm %s225_s1, 256 }
  0x14   :  { %p121_p8 = scmp.ne.s32.totalorder %s225_s1, %s120_s25  ;;  %p124_p9 = scmp.lt.u32.totalorder %s120_s25, %s225_s1 }
  0x16   :  { %p126_p10 = pnand %p124_p9, %p121_p8 }
  0x18   :  { %129 = shalt.err (!%p126_p10)
}
  0x19   :  { %s130_s30 = scalar_lea.vmem %s27_s12, 256  ;;  %p135_p12 = scmp.lt.s32.totalorder %s27_s12, %s27_s12 }
  0x1a   :  { %p131_p11 = scmp.ne.s32.totalorder %s27_s12, %s130_s30  ;;  %p136_p13 = scmp.lt.s32.totalorder %s130_s30, %s130_s30 }
  0x1c   :  { %p137_p0 = por %p136_p13, %p135_p12 }
  0x1e   :  { %p138_p1 = pnand %p137_p0, %p131_p11 }
  0x20   :  { %141 = shalt.err (!%p138_p1)
}
  0x21   :  { %29 = dma.hbm_to_vmem [thread:$0]  %s225_s1, 256, %s27_s12, [#allocation6]  }
  0x22   :  { %164 = dma.done.wait [#allocation3], 256  }
  0x23   :  { %165 = vsyncadd [#allocation3], 4294967040 }
  0x24   :  { %166 = dma.done.wait [#allocation6], 256  }
  0x25   :  { %167 = vsyncadd [#allocation6], 4294967040  ;;  %v39_v0 = vld [vmem:[#allocation2] sm:$0xff]  ;;  %v53_v1 = vld [vmem:[#allocation2 + $0x8] sm:$0xff]  ;;  %s172_s1 = smov [#allocation7]  }
  0x26   :  { %v85_v2 = vmul.f32 -1.442695, %v39_v0  ;;  %v86_v3 = vmul.f32 -1.442695, %v53_v1  ;;  %v42_v8 = vld [vmem:[#allocation5] sm:$0xff]  ;;  %v54_v9 = vld [vmem:[#allocation5 + $0x8] sm:$0xff] }
  0x27   :  { %s75_s4 = sshll.u32 %s172_s1, 4  ;;  %s76_s4 = int_to_ptr.vmem [resolvable:$true] %s75_s4 }
  0x28   :  { %90 = vpow2.f32 %v85_v2  ;;  %s142_s5 = scalar_lea.vmem %s76_s4, 256  ;;  %p147_p3 = scmp.lt.s32.totalorder %s76_s4, %s76_s4 }
  0x29   :  { %92 = vpow2.f32 %v86_v3  ;;  %p143_p2 = scmp.ne.s32.totalorder %s76_s4, %s142_s5  ;;  %p148_p4 = scmp.lt.s32.totalorder %s142_s5, %s142_s5 }
  0x2b   :  { %p149_p5 = por %p148_p4, %p147_p3 }
  0x2d   :  { %p150_p6 = pnand %p149_p5, %p143_p2 }
  0x32   :  { %v91_v4 = vpop.eup %90 }
  0x33   :  { %v93_v5 = vpop.eup %92  ;;  %v46_v6 = vadd.f32 1.0, %v91_v4 }
  0x34   :  { %v58_v7 = vadd.f32 1.0, %v93_v5 }
  0x35   :  { %94 = vrcp.f32 %v46_v6 }
  0x36   :  { %96 = vrcp.f32 %v58_v7 }
  0x3f   :  { %v95_v10 = vpop.eup %94 }
  0x40   :  { %v97_v11 = vpop.eup %96  ;;  %v49_v12 = vmul.f32 %v95_v10, %v42_v8  ;;  %v51_v13 = vadd.f32 %v95_v10, %v42_v8 }
  0x41   :  { %v61_v14 = vmul.f32 %v97_v11, %v54_v9  ;;  %v63_v15 = vadd.f32 %v97_v11, %v54_v9 }
  0x43   :  { %v62_v16 = vadd.f32 %v61_v14, %v49_v12  ;;  %v64_v17 = vadd.f32 %v63_v15, %v51_v13 }
  0x45   :  { %67 = vst [vmem:[#allocation7] sm:$0xff] %v62_v16  ;;  %68 = vst [vmem:[#allocation7 + $0x8] sm:$0xff] %v64_v17 }
  0x46   :  { %153 = shalt.err (!%p150_p6)
}
  0x47   :  { %s154_s8 = scalar_lea.hbm %s226_s2, 256 }
  0x48   :  { %p155_p7 = scmp.ne.s32.totalorder %s226_s2, %s154_s8  ;;  %p158_p8 = scmp.lt.u32.totalorder %s154_s8, %s226_s2 }
  0x4a   :  { %p160_p9 = pnand %p158_p8, %p155_p7 }
  0x4c   :  { %163 = shalt.err (!%p160_p9)
}
  0x4d   :  { %78 = dma.vmem_to_hbm [thread:$0]  %s76_s4, 256, %s226_s2, [#allocation4]  }
  0x4e   :  { %168 = dma.done.wait [#allocation4], 256  }
  0x4f   :  { %169 = vsyncadd [#allocation4], 4294967040 }
  0x50   :  { %82 = vsyncpa [#allocation3], 1 }
  0x51   :  { %83 = vsyncpa [#allocation6], 1 }
  0x52   :  { %84 = vsyncpa [#allocation4], 1 }

</bundles_post_ra>
